<compile_context>
chip_gen: v5e
topology: v5e:2x2
jax: 0.10.0
libtpu: 0.0.40
codegen_flags: <defaults>
</compile_context>

<pallas_src>
import jax
import jax.numpy as jnp
from jax.experimental import pallas as pl
from jax.experimental.pallas import tpu as pltpu


# ----------------------------------------------------------------------------- kernel
def _prefix_mlp_kernel(x_ref, w1_ref, b1_ref, w2_ref, b2_ref, o_ref):
    # x:  (attn_bn, n_embd)  bf16, resident (same block every grid step)
    # w1: (n_embd, mid_dim)  bf16, resident;  b1: (1, mid_dim) f32, resident
    # w2: (mid_dim, TN)      bf16, streamed;  b2: (1, TN)      f32, streamed
    # o:  (attn_bn, TN)      f32,  streamed (lane-dense, TN % 128 == 0)
    #
    # Recompute h per tile: attn_bn * n_embd * mid_dim FLOPs is negligible next
    # to the streamed W2 bytes, and it avoids a cross-core scratch hazard when
    # the N grid axis is megacore-parallel.
    h = jnp.tanh(
        jnp.dot(x_ref[...], w1_ref[...], preferred_element_type=jnp.float32)
        + b1_ref[...]
    )
    o_ref[...] = (
        jnp.dot(h.astype(w2_ref.dtype), w2_ref[...],
                preferred_element_type=jnp.float32)
        + b2_ref[...]
    ).astype(o_ref.dtype)


def _pick_tile_n(out_dim: int) -> int:
    """Lane tile for the streamed W2 / output dimension.

    Multiple of 128 (unmasked, lane-dense vst).  2048 lanes keeps two
    double-buffered bf16 W2 tiles + f32 output tiles comfortably under the
    32 MiB scoped-VMEM default (and v7x's 64 MiB physical VMEM) even at
    production mid_dim ~ 800, while being large enough to hide the ~0.35 us
    per-grid-step overhead.
    """
    if out_dim <= 128:
        return out_dim                     # full dim: (8,128) rule trivially met
    tn = min(2048, out_dim)
    return (tn // 128) * 128               # ragged edge (if any) is masked by Pallas


def prefix_mlp(x, w1, b1, w2, b2, *, out_dtype=jnp.float32):
    """tanh(x @ w1 + b1) @ w2 + b2 with the output (N) dimension streamed."""
    attn_bn, n_embd = x.shape
    mid_dim = w1.shape[1]
    out_dim = w2.shape[1]
    b1 = b1.reshape(1, mid_dim).astype(jnp.float32)
    b2 = b2.reshape(1, out_dim).astype(jnp.float32)

    tn = _pick_tile_n(out_dim)
    grid = (pl.cdiv(out_dim, tn),)

    grid_spec = pltpu.PrefetchScalarGridSpec(
        num_scalar_prefetch=0,
        grid=grid,
        in_specs=[
            pl.BlockSpec((attn_bn, n_embd), lambda j: (0, 0)),   # resident
            pl.BlockSpec((n_embd, mid_dim), lambda j: (0, 0)),   # resident
            pl.BlockSpec((1, mid_dim),      lambda j: (0, 0)),   # resident
            pl.BlockSpec((mid_dim, tn),     lambda j: (0, j)),   # streamed (hot)
            pl.BlockSpec((1, tn),           lambda j: (0, j)),   # streamed
        ],
        out_specs=pl.BlockSpec((attn_bn, tn), lambda j: (0, j)),  # lane-dense
    )
    return pl.pallas_call(
        _prefix_mlp_kernel,
        out_shape=jax.ShapeDtypeStruct((attn_bn, out_dim), out_dtype),
        grid_spec=grid_spec,
        compiler_params=pltpu.CompilerParams(
            # Output tiles are independent -> megacore split on v7x; no-op on
            # single-TC v5e/v6e.
            dimension_semantics=("parallel",),
            vmem_limit_bytes=48 * 1024 * 1024,
        ),
    )(x, w1, b1, w2, b2)


# --------------------------------------------------------------------------- module
class BioPrefixPallas:
    def __init__(self, num_hidden_layers, num_attention_heads, hidden_size,
                 prefix_attn_bn=8, prefix_mid_dim=64, key=None,
                 param_dtype=jnp.bfloat16):
        self.match_n_layer = num_hidden_layers
        self.match_n_head = num_attention_heads
        self.n_embd = hidden_size
        self.match_n_embd = self.n_embd // self.match_n_head
        self.mid_dim = prefix_mid_dim
        self.attn_bn = prefix_attn_bn
        out_dim = self.match_n_layer * 2 * self.n_embd

        key = key if key is not None else jax.random.PRNGKey(0)
        ks = jax.random.split(key, 5)

        def init(k, shape, scale=0.02):
            return (scale * jax.random.normal(k, shape)).astype(jnp.float32)

        # Decoder ("self") prefix -- the only branch whose result is returned.
        # Weights in bf16 (memory-bound W2 stream), biases in f32.
        self.wte = init(ks[0], (self.attn_bn, self.n_embd)).astype(param_dtype)
        self.w1 = init(ks[1], (self.n_embd, self.mid_dim)).astype(param_dtype)
        self.b1 = init(ks[2], (self.mid_dim,))
        self.w2 = init(ks[3], (self.mid_dim, out_dim)).astype(param_dtype)
        self.b2 = init(ks[4], (out_dim,))
        # NOTE: the PyTorch module's wte2/control_trans2 and wte_enc/
        # control_trans_enc branches are dead code w.r.t. the returned result,
        # so they are neither instantiated nor computed here.

    def __call__(self, bsz, nsamples=1):
        bsz = bsz * nsamples
        seqlen = self.attn_bn

        # Hot path: one Pallas call, batch-invariant.
        flat = prefix_mlp(self.wte, self.w1, self.b1, self.w2, self.b2)  # (attn_bn, L*2*n_embd)

        # Layout glue: batch broadcast, (bsz, seqlen, L*2, H, d) view, permute.
        pkv = jnp.broadcast_to(flat[None], (bsz,) + flat.shape)
        pkv = pkv.reshape(bsz, seqlen, self.match_n_layer * 2,
                          self.match_n_head, self.match_n_embd)
        # dropout(p=0) is identity
        pkv = jnp.transpose(pkv, (2, 0, 3, 1, 4))        # (L*2, bsz, H, seqlen, d)

        mask = jnp.zeros((bsz, seqlen), jnp.float32)     # hoisted; shared by all layers
        result = []
        for i in range(self.match_n_layer):
            prev_key = pkv[2 * i].reshape(bsz * self.match_n_head, -1, self.match_n_embd)
            prev_value = pkv[2 * i + 1].reshape(bsz * self.match_n_head, -1, self.match_n_embd)
            result.append([prev_key, prev_value, mask])
        return result


# ------------------------------------------------------------------------------ main
if __name__ == "__main__":
    # Small synthetic config (BioGPT-like but tiny):
    num_hidden_layers = 2
    num_attention_heads = 4
    hidden_size = 32
    attn_bn = 8
    mid_dim = 64
    bsz = 2
    d_head = hidden_size // num_attention_heads

    mod = BioPrefixPallas(num_hidden_layers, num_attention_heads, hidden_size,
                          prefix_attn_bn=attn_bn, prefix_mid_dim=mid_dim,
                          key=jax.random.PRNGKey(0))

    result = mod(bsz)
    result = jax.block_until_ready(result)

    # Pure-JAX reference mirroring the kernel math (bf16 operands, f32 accum).
    h_ref = jnp.tanh(
        jnp.dot(mod.wte, mod.w1, preferred_element_type=jnp.float32)
        + mod.b1[None, :]
    )
    ref_flat = (
        jnp.dot(h_ref.astype(jnp.bfloat16), mod.w2,
                preferred_element_type=jnp.float32)
        + mod.b2[None, :]
    )
    ref = jnp.broadcast_to(ref_flat[None], (bsz,) + ref_flat.shape).reshape(
        bsz, attn_bn, num_hidden_layers * 2, num_attention_heads, d_head)
    ref = jnp.transpose(ref, (2, 0, 3, 1, 4))

    for i in range(num_hidden_layers):
        rk = ref[2 * i].reshape(bsz * num_attention_heads, -1, d_head)
        rv = ref[2 * i + 1].reshape(bsz * num_attention_heads, -1, d_head)
        assert result[i][0].shape == rk.shape
        assert result[i][1].shape == rv.shape
        assert jnp.allclose(result[i][0], rk, atol=1e-3, rtol=1e-2)
        assert jnp.allclose(result[i][1], rv, atol=1e-3, rtol=1e-2)
        assert result[i][2].shape == (bsz, attn_bn)
        assert jnp.all(result[i][2] == 0.0)

    print("KERNEL_OK")
</pallas_src>

<mosaic_0001>
module attributes {stable_mosaic.version = 11 : i64} {
  func.func @_prefix_mlp_kernel(%arg0: i32, %arg1: memref<8x32xbf16, #tpu.memory_space<vmem>>, %arg2: memref<32x64xbf16, #tpu.memory_space<vmem>>, %arg3: memref<1x64xf32, #tpu.memory_space<vmem>>, %arg4: memref<64x128xbf16, #tpu.memory_space<vmem>>, %arg5: memref<1x128xf32, #tpu.memory_space<vmem>>, %arg6: memref<8x128xf32, #tpu.memory_space<vmem>>) attributes {dimension_semantics = [#tpu.dimension_semantics<parallel>], iteration_bounds = array<i64: 1>, scalar_prefetch = 0 : i64, scratch_operands = 0 : i64, tpu.core_type = #tpu.core_type<tc>, window_params = [{pipeline_mode = #tpu.pipeline_mode<synchronous>, transform_indices = @transform_0, window_bounds = array<i64: 8, 32>}, {pipeline_mode = #tpu.pipeline_mode<synchronous>, transform_indices = @transform_1, window_bounds = array<i64: 32, 64>}, {pipeline_mode = #tpu.pipeline_mode<synchronous>, transform_indices = @transform_2, window_bounds = array<i64: 1, 64>}, {transform_indices = @transform_3, window_bounds = array<i64: 64, 128>}, {transform_indices = @transform_4, window_bounds = array<i64: 1, 128>}, {transform_indices = @transform_5, window_bounds = array<i64: 8, 128>}]} {
    %c0 = arith.constant 0 : index
    %c0_0 = arith.constant 0 : index
    %0 = vector.load %arg1[%c0, %c0_0] : memref<8x32xbf16, #tpu.memory_space<vmem>>, vector<8x32xbf16>
    %c0_1 = arith.constant 0 : index
    %c0_2 = arith.constant 0 : index
    %1 = vector.load %arg2[%c0_1, %c0_2] : memref<32x64xbf16, #tpu.memory_space<vmem>>, vector<32x64xbf16>
    %cst = arith.constant dense<0.000000e+00> : vector<8x64xf32>
    %2 = tpu.matmul %0, %1, %cst {dimension_numbers = #tpu.dot_dimension_numbers<[1], [0], [0], [1], [0, 0, 1, 1], [], []>} : vector<8x32xbf16>, vector<32x64xbf16>, vector<8x64xf32> -> vector<8x64xf32>
    %c0_3 = arith.constant 0 : index
    %c0_4 = arith.constant 0 : index
    %3 = vector.load %arg3[%c0_3, %c0_4] : memref<1x64xf32, #tpu.memory_space<vmem>>, vector<1x64xf32>
    %4 = vector.broadcast %3 : vector<1x64xf32> to vector<8x64xf32>
    %5 = arith.addf %2, %4 : vector<8x64xf32>
    %6 = math.tanh %5 : vector<8x64xf32>
    %7 = arith.truncf %6 : vector<8x64xf32> to vector<8x64xbf16>
    %c0_5 = arith.constant 0 : index
    %c0_6 = arith.constant 0 : index
    %8 = vector.load %arg4[%c0_5, %c0_6] : memref<64x128xbf16, #tpu.memory_space<vmem>>, vector<64x128xbf16>
    %cst_7 = arith.constant dense<0.000000e+00> : vector<8x128xf32>
    %9 = tpu.matmul %7, %8, %cst_7 {dimension_numbers = #tpu.dot_dimension_numbers<[1], [0], [0], [1], [0, 0, 1, 1], [], []>} : vector<8x64xbf16>, vector<64x128xbf16>, vector<8x128xf32> -> vector<8x128xf32>
    %c0_8 = arith.constant 0 : index
    %c0_9 = arith.constant 0 : index
    %10 = vector.load %arg5[%c0_8, %c0_9] : memref<1x128xf32, #tpu.memory_space<vmem>>, vector<1x128xf32>
    %11 = vector.broadcast %10 : vector<1x128xf32> to vector<8x128xf32>
    %12 = arith.addf %9, %11 : vector<8x128xf32>
    %c0_10 = arith.constant 0 : index
    %c0_11 = arith.constant 0 : index
    %13 = vector.load %arg6[%c0_10, %c0_11] : memref<8x128xf32, #tpu.memory_space<vmem>>, vector<8x128xf32>
    tpu.vector_store %arg6[%c0_10, %c0_11], %12 {strides = array<i32>} : memref<8x128xf32, #tpu.memory_space<vmem>>, vector<8x128xf32>,
    return
  }
  func.func @transform_0(%arg0: i32) -> (i32, i32) {
    %c0_i32 = arith.constant 0 : i32
    %c0_i32_0 = arith.constant 0 : i32
    %c0_i32_1 = arith.constant 0 : i32
    return %c0_i32, %c0_i32_0 : i32, i32
  }
  func.func @transform_1(%arg0: i32) -> (i32, i32) {
    %c0_i32 = arith.constant 0 : i32
    %c0_i32_0 = arith.constant 0 : i32
    %c0_i32_1 = arith.constant 0 : i32
    return %c0_i32, %c0_i32_0 : i32, i32
  }
  func.func @transform_2(%arg0: i32) -> (i32, i32) {
    %c0_i32 = arith.constant 0 : i32
    %c0_i32_0 = arith.constant 0 : i32
    %c0_i32_1 = arith.constant 0 : i32
    return %c0_i32, %c0_i32_0 : i32, i32
  }
  func.func @transform_3(%arg0: i32) -> (i32, i32) {
    %c0_i32 = arith.constant 0 : i32
    %c0_i32_0 = arith.constant 0 : i32
    return %c0_i32, %arg0 : i32, i32
  }
  func.func @transform_4(%arg0: i32) -> (i32, i32) {
    %c0_i32 = arith.constant 0 : i32
    %c0_i32_0 = arith.constant 0 : i32
    return %c0_i32, %arg0 : i32, i32
  }
  func.func @transform_5(%arg0: i32) -> (i32, i32) {
    %c0_i32 = arith.constant 0 : i32
    %c0_i32_0 = arith.constant 0 : i32
    return %c0_i32, %arg0 : i32, i32
  }
}

</mosaic_0001>

<bundles_post_ra>
// kernel: tpu_custom_call.1
= control target key start
LH: loop header
LB: loop body
LE: loop exit
PB: predicated region body
PF: predicated region fallthrough
CT: control target
= control target key end

     0   :  { %10 = vsyncpa [#allocation3], 0  ;;  %s377_s0 = inlined_call_operand.hbm [shape: bf16[8,32], index: 0, kind: input, shape index: {}]   ;;  %s378_s1 = inlined_call_operand.hbm [shape: bf16[32,64], index: 1, kind: input, shape index: {}]   ;;  %s379_s2 = inlined_call_operand.vmem [shape: f32[1,64], index: 2, kind: input, shape index: {}]   ;;  %s380_s3 = inlined_call_operand.hbm [shape: bf16[64,128], index: 3, kind: input, shape index: {}]   ;;  %s381_s4 = inlined_call_operand.vmem [shape: f32[1,128], index: 4, kind: input, shape index: {}]   ;;  %s382_s5 = inlined_call_operand.hbm [shape: f32[8,128], index: 5, kind: output, shape index: {}]  }
   0x1   :  { %11 = vsyncpa [#allocation6], 0  ;;  %s28_s20 = sshll.u32 %s378_s1, 4  ;;  %s29_s20 = int_to_ptr.hbm [resolvable:$true] %s28_s20 }
   0x2   :  { %12 = vsyncpa [#allocation4], 0  ;;  %s323_s21 = smov [#allocation5]   ;;  %s18_s25 = sshll.u32 %s377_s0, 4  ;;  %s19_s25 = int_to_ptr.hbm [resolvable:$true] %s18_s25 }
   0x3   :  { %s30_s22 = sshll.u32 %s323_s21, 4  ;;  %s324_s26 = smov 64   ;;  %s31_s22 = int_to_ptr.vmem [resolvable:$true] %s30_s22 }
   0x4   :  { %s325_s27 = smov 4   ;;  %s326_s28 = smov [#allocation2]  }
   0x5   :  { %36 = dma.hbm_to_vmem [thread:$0]  %s29_s20, 256, %s31_s22, [#allocation6], %s324_s26, %s324_s26, %s325_s27  }
   0x6   :  { %s20_s29 = sshll.u32 %s326_s28, 4  ;;  %s43_s7 = sshll.u32 %s380_s3, 4  ;;  %s21_s29 = int_to_ptr.vmem [resolvable:$true] %s20_s29  ;;  %s44_s7 = int_to_ptr.hbm [resolvable:$true] %s43_s7 }
   0x7   :  { %23 = dma.hbm_to_vmem [thread:$0]  %s19_s25, 64, %s21_s29, [#allocation3]  }
   0x8   :  { %s327_s1 = smov [#allocation7]  }
   0x9   :  { %s45_s8 = sshll.u32 %s327_s1, 4  ;;  %s46_s8 = int_to_ptr.vmem [resolvable:$true] %s45_s8 }
   0xa   :  { %51 = dma.hbm_to_vmem [thread:$0]  %s44_s7, 512, %s46_s8, [#allocation6], %s324_s26, %s324_s26, %s325_s27  }
   0xb   :  { %317 = dma.done.wait [#allocation3], 64  }
   0xc   :  { %318 = vsyncadd [#allocation3], 4294967232 }
   0xd   :  { %319 = dma.done.wait [#allocation6], 768  }
   0xe   :  { %320 = vsyncadd [#allocation6], 4294966528  ;;  %v206_v0 = vld [vmem:[#allocation5 + $0x8] sm:$0xff]  ;;  %v205_v2 = vld [vmem:[#allocation5] sm:$0xff]  ;;  %vm88_vm0 = vcmask 261120   ;;  %vm143_vm1 = vcmask 523264  }
   0xf   :  { %v210_v1 = vld [vmem:[#allocation7 + $0x18] sm:$0xff]  ;;  %98 = vmatpush.bf16.msra.mxu0 %v206_v0  ;;  %v67_v3 = vld [vmem:[#allocation2] sm:$0xf]  ;;  %v209_v4 = vld [vmem:[#allocation7 + $0x10] sm:$0xff]  ;;  %s328_s11 = smov [#allocation8]   ;;  %s168_s15 = sshll.u32 %s382_s5, 4  ;;  %s169_s15 = int_to_ptr.hbm [resolvable:$true] %s168_s15 }
  0x10   :  { %151 = vmatpush.bf16.msra.mxu1 %v210_v1  ;;  %v208_v5 = vld [vmem:[#allocation7 + $0x8] sm:$0xff]  ;;  %v207_v6 = vld [vmem:[#allocation7] sm:$0xff]  ;;  %s166_s12 = sshll.u32 %s328_s11, 4  ;;  %s167_s12 = int_to_ptr.vmem [resolvable:$true] %s166_s12 }
  0x11   :  { %v217_v7 = vld [vmem:[%s379_s2] ss:$0 sm:$0xff] }
  0x12   :  { %v218_v13 = vld [vmem:[%s381_s4] ss:$0 sm:$0xff] }
  0x13   :  { %99 = vmatpush.bf16.msra.mxu0 %v205_v2 }
  0x14   :  { %152 = vmatpush.bf16.msra.mxu1 %v209_v4 }
  0x16   :  { %187 = vmatmul.msk.bf16.vlgmr.msra.gmra.mxu0 %vm88_vm0, %v67_v3 }
  0x18   :  { %153 = vmatpush.bf16.msra.mxu1 %v208_v5 }
  0x1c   :  { %154 = vmatpush.bf16.msra.mxu1 %v207_v6 }
  0x93   :  { %v101_v8 = vpop.f32.mrf.mxu0 }
  0x94   :  { %v102_v9 = vadd.f32 %v217_v7, %v101_v8 }
  0x96   :  { %219 = vtanh.f32 %v102_v9 }
  0x9b   :  { %v103_v10 = vpop.f32.mrf.mxu0 }
  0x9c   :  { %v220_v11 = vpop.eup %219 }
  0x9d   :  { %v106_v12 = vpack.c.bf16 %v220_v11, %v220_v11 }
  0x9f   :  { %204 = vmatmul.msk.bf16.vlgmr.msra.gmra.mxu1 %vm143_vm1, %v106_v12 }
 0x11c   :  { %v156_v14 = vpop.f32.mrf.mxu1 }
 0x11d   :  { %v157_v15 = vadd.f32 %v218_v13, %v156_v14 }
 0x11f   :  { %160 = vst [vmem:[#allocation8] sm:$0xff] %v157_v15 }
 0x120   :  { %171 = dma.vmem_to_hbm [thread:$0]  %s167_s12, 128, %s169_s15, [#allocation4]  }
 0x124   :  { %v158_v16 = vpop.f32.mrf.mxu1 }
 0x125   :  { %321 = dma.done.wait [#allocation4], 128  }
 0x126   :  { %322 = vsyncadd [#allocation4], 4294967168 }
 0x127   :  { %176 = vsyncpa [#allocation3], 1 }
 0x128   :  { %177 = vsyncpa [#allocation6], 1 }
 0x129   :  { %178 = vsyncpa [#allocation4], 1 }

</bundles_post_ra>
